<compile_context>
chip_gen: v7x
topology: tpu7x:2x2x1
jax: 0.10.0
libtpu: 0.0.40
codegen_flags: <defaults>
</compile_context>

<pallas_src>
import jax
import jax.numpy as jnp
from jax.experimental import pallas as pl
from jax.experimental.pallas import tpu as pltpu


def _round_up(x, m):
    return (x + m - 1) // m * m


def _estimate_vmem(tm, tk, kv_p, vocab_p):
    """Rough VMEM working-set estimate (double-buffered inputs)."""
    return (2 * tm * 128 * 4            # ids tile (sublane/lane padded)
            + 2 * vocab_p * kv_p * 2    # embedding table (bf16)
            + 2 * kv_p * tk * 2         # W1 slice (bf16)
            + 2 * 8 * tk * 4            # b1 slice
            + 2 * tk * kv_p * 2         # W2 slice (bf16)
            + 2 * 8 * kv_p * 4          # b2
            + 2 * tm * kv_p * 4         # f32 output tile (resident accumulator)
            + tm * kv_p * 2)            # gathered-x scratch (bf16)


def _pick_tiles(n, kv, hid, vocab, budget=56 << 20):
    kv_p = _round_up(kv, 128)
    vocab_p = _round_up(vocab, 8)
    tm = min(256, _round_up(n, 8))
    tk = min(512, _round_up(hid, 128))
    # Shrink the hidden (reduction) tile first, then the row tile, until the
    # working set fits a conservative VMEM budget (v7x has only 64 MiB).
    while _estimate_vmem(tm, tk, kv_p, vocab_p) > budget and tk > 128:
        tk -= 128
    while _estimate_vmem(tm, tk, kv_p, vocab_p) > budget and tm > 8:
        tm //= 2
    return tm, tk, kv_p, vocab_p


def _prefix_mlp_kernel(ids_ref, emb_ref, w1_ref, b1_ref, w2_ref, b2_ref,
                       o_ref, x_sc):
    # ids_ref : (tm, 1)      int32 token ids for this row tile
    # emb_ref : (V, kv_p)    bf16 embedding table (whole, lane-padded)
    # w1_ref  : (kv_p, tk)   bf16 first Linear weight slice ((in, out) layout)
    # b1_ref  : (1, tk)      f32 bias slice
    # w2_ref  : (tk, kv_p)   bf16 second Linear weight slice
    # b2_ref  : (1, kv_p)    f32 bias
    # o_ref   : (tm, kv_p)   f32 output tile (doubles as the accumulator)
    # x_sc    : (tm, kv_p)   bf16 gathered activations (persist across k)
    k = pl.program_id(1)

    @pl.when(k == 0)
    def _gather_and_init():
        ids = ids_ref[...]                                       # (tm, 1)
        vocab = emb_ref.shape[0]
        onehot = (ids == jax.lax.broadcasted_iota(
            jnp.int32, (ids.shape[0], vocab), 1)).astype(emb_ref.dtype)
        # Exact gather on the MXU: one-hot rows select embedding rows.
        x = jnp.dot(onehot, emb_ref[...], preferred_element_type=jnp.float32)
        x_sc[...] = x.astype(x_sc.dtype)
        # Seed the resident output tile with the second bias; the k-loop
        # accumulates on top of it.
        o_ref[...] = jnp.broadcast_to(b2_ref[...], o_ref.shape).astype(
            o_ref.dtype)

    # Hidden-slice of the MLP; tanh is elementwise over hidden, so this is an
    # exact K-reduction:  out += tanh(x @ W1[:, k] + b1[k]) @ W2[k, :]
    h = jnp.dot(x_sc[...], w1_ref[...], preferred_element_type=jnp.float32)
    h = jnp.tanh(h + b1_ref[...])                                # f32 tanh (v5e-safe)
    o_ref[...] += jnp.dot(h.astype(w2_ref.dtype), w2_ref[...],
                          preferred_element_type=jnp.float32)


def prefix_encoder_forward(prefix, params, *, tm=None, tk=None):
    """prefix: (B, L) int ids.  Returns (B, L, kv_size) float32."""
    b, l = prefix.shape
    emb = params["embedding"]
    vocab, kv = emb.shape
    hid = params["w1"].shape[1]
    n = b * l

    # NOTE: for genuinely tiny problems (like the demo config) plain jnp would
    # beat kernel-launch/DMA overhead; the Pallas path is always taken here so
    # the kernel gets exercised.

    # ---- tile / padding choices -------------------------------------------
    tm_auto, tk_auto, kv_p, vocab_p = _pick_tiles(n, kv, hid, vocab)
    tm = tm_auto if tm is None else tm
    tk = tk_auto if tk is None else tk
    assert tm % 8 == 0 and tk % 128 == 0
    hid_p = _round_up(hid, tk)
    n_p = _round_up(n, tm)

    # ---- pad / cast parameters (bf16 MXU operands, f32 biases) -------------
    f32, bf16 = jnp.float32, jnp.bfloat16
    emb_p = jnp.zeros((vocab_p, kv_p), bf16).at[:vocab, :kv].set(emb.astype(bf16))
    w1_p = jnp.zeros((kv_p, hid_p), bf16).at[:kv, :hid].set(
        params["w1"].astype(bf16))
    b1_p = jnp.zeros((1, hid_p), f32).at[:, :hid].set(params["b1"].astype(f32))
    w2_p = jnp.zeros((hid_p, kv_p), bf16).at[:hid, :kv].set(
        params["w2"].astype(bf16))
    b2_p = jnp.zeros((1, kv_p), f32).at[:, :kv].set(params["b2"].astype(f32))
    ids = jnp.zeros((n_p, 1), jnp.int32).at[:n, 0].set(
        prefix.reshape(-1).astype(jnp.int32))

    grid = (n_p // tm, hid_p // tk)

    # ---- VMEM budget & cost hint -------------------------------------------
    est = _estimate_vmem(tm, tk, kv_p, vocab_p)
    vmem_limit = int(min(max(int(est * 1.25), 32 << 20), 64 << 20))

    cost = pl.CostEstimate(
        flops=2 * n_p * vocab_p * kv_p + 4 * n_p * kv_p * hid_p,
        transcendentals=n_p * hid_p,
        bytes_accessed=((n_p // tm) * 2 * (kv_p * hid_p * 2)
                        + vocab_p * kv_p * 2 + n_p * 4 + n_p * kv_p * 4),
    )

    out = pl.pallas_call(
        _prefix_mlp_kernel,
        out_shape=jax.ShapeDtypeStruct((n_p, kv_p), f32),
        grid_spec=pltpu.PrefetchScalarGridSpec(
            num_scalar_prefetch=0,
            grid=grid,
            in_specs=[
                pl.BlockSpec((tm, 1), lambda i, k: (i, 0)),          # ids
                pl.BlockSpec((vocab_p, kv_p), lambda i, k: (0, 0)),  # emb table
                pl.BlockSpec((kv_p, tk), lambda i, k: (0, k)),       # W1 slice
                pl.BlockSpec((1, tk), lambda i, k: (0, k)),          # b1 slice
                pl.BlockSpec((tk, kv_p), lambda i, k: (k, 0)),       # W2 slice
                pl.BlockSpec((1, kv_p), lambda i, k: (0, 0)),        # b2
            ],
            out_specs=pl.BlockSpec((tm, kv_p), lambda i, k: (i, 0)),
            scratch_shapes=[
                pltpu.VMEM((tm, kv_p), bf16),   # gathered activations
            ]),
        compiler_params=pltpu.CompilerParams(
            dimension_semantics=("parallel", "arbitrary"),
            vmem_limit_bytes=vmem_limit),
        cost_estimate=cost,
    )(ids, emb_p, w1_p, b1_p, w2_p, b2_p)

    return out[:n, :kv].reshape(b, l, kv)


def init_params(key, kv_size, hidden_size, vocab=128, dtype=jnp.float32):
    k_emb, k_w1, k_b1, k_w2, k_b2 = jax.random.split(key, 5)
    # Deterministic synthetic init (not a checkpoint load).
    return {
        "embedding": jax.random.normal(k_emb, (vocab, kv_size), dtype) * 0.02,
        # stored as (in, out): equivalent to torch Linear weight (out, in).T
        "w1": jax.random.normal(k_w1, (kv_size, hidden_size), dtype) * 0.02,
        "b1": jax.random.normal(k_b1, (1, hidden_size), dtype) * 0.02,
        "w2": jax.random.normal(k_w2, (hidden_size, kv_size), dtype) * 0.02,
        "b2": jax.random.normal(k_b2, (1, kv_size), dtype) * 0.02,
    }


if __name__ == "__main__":
    # Small config consistent with the module:
    #   kv_size = num_layers * kv_channels * multi_query_group_num * 2
    num_layers, kv_channels, multi_query_group_num = 2, 4, 2
    kv_size = num_layers * kv_channels * multi_query_group_num * 2   # 32
    hidden_size = 32
    batch, prefix_len = 2, 8

    key = jax.random.PRNGKey(0)
    k_params, k_prefix = jax.random.split(key)
    params = init_params(k_params, kv_size, hidden_size)

    prefix = jax.random.randint(k_prefix, (batch, prefix_len), 0, 128,
                                dtype=jnp.int32)

    out = prefix_encoder_forward(prefix, params)
    out = jax.block_until_ready(out)

    # Reference in plain JAX mirroring the kernel's bf16 MXU numerics.
    emb16 = params["embedding"].astype(jnp.bfloat16).astype(jnp.float32)
    w1_16 = params["w1"].astype(jnp.bfloat16).astype(jnp.float32)
    w2_16 = params["w2"].astype(jnp.bfloat16).astype(jnp.float32)
    tok = jnp.take(emb16, prefix.reshape(-1), axis=0)
    h = jnp.tanh(tok @ w1_16 + params["b1"])
    h = h.astype(jnp.bfloat16).astype(jnp.float32)
    ref = (h @ w2_16 + params["b2"]).reshape(batch, prefix_len, kv_size)

    assert out.shape == (batch, prefix_len, kv_size)
    assert jnp.allclose(out, ref, atol=1e-3, rtol=1e-2), (
        float(jnp.max(jnp.abs(out - ref))))

    print("KERNEL_OK")
</pallas_src>

<mosaic_0001>
module attributes {stable_mosaic.version = 11 : i64} {
  func.func @_prefix_mlp_kernel(%arg0: i32, %arg1: i32, %arg2: memref<16x1xi32, #tpu.memory_space<vmem>>, %arg3: memref<128x128xbf16, #tpu.memory_space<vmem>>, %arg4: memref<128x128xbf16, #tpu.memory_space<vmem>>, %arg5: memref<1x128xf32, #tpu.memory_space<vmem>>, %arg6: memref<128x128xbf16, #tpu.memory_space<vmem>>, %arg7: memref<1x128xf32, #tpu.memory_space<vmem>>, %arg8: memref<16x128xf32, #tpu.memory_space<vmem>>, %arg9: memref<16x128xbf16, #tpu.memory_space<vmem>>) attributes {dimension_semantics = [#tpu.dimension_semantics<parallel>, #tpu.dimension_semantics<arbitrary>], iteration_bounds = array<i64: 1, 1>, scalar_prefetch = 0 : i64, scratch_operands = 1 : i64, tpu.core_type = #tpu.core_type<tc>, window_params = [{transform_indices = @transform_0, window_bounds = array<i64: 16, 1>}, {pipeline_mode = #tpu.pipeline_mode<synchronous>, transform_indices = @transform_1, window_bounds = array<i64: 128, 128>}, {transform_indices = @transform_2, window_bounds = array<i64: 128, 128>}, {transform_indices = @transform_3, window_bounds = array<i64: 1, 128>}, {transform_indices = @transform_4, window_bounds = array<i64: 128, 128>}, {pipeline_mode = #tpu.pipeline_mode<synchronous>, transform_indices = @transform_5, window_bounds = array<i64: 1, 128>}, {transform_indices = @transform_6, window_bounds = array<i64: 16, 128>}]} {
    %c0_i32 = arith.constant 0 : i32
    %0 = arith.cmpi eq, %arg1, %c0_i32 : i32
    %1 = arith.extui %0 : i1 to i32
    %c0_i32_0 = arith.constant 0 : i32
    %2 = arith.cmpi ne, %1, %c0_i32_0 : i32
    scf.if %2 {
      %c0_13 = arith.constant 0 : index
      %c0_14 = arith.constant 0 : index
      %16 = vector.load %arg2[%c0_13, %c0_14] : memref<16x1xi32, #tpu.memory_space<vmem>>, vector<16x1xi32>
      %17 = tpu.iota {dimensions = array<i32: 1>} : vector<16x128xi32>
      %18 = vector.broadcast %16 : vector<16x1xi32> to vector<16x128xi32>
      %19 = arith.cmpi eq, %18, %17 : vector<16x128xi32>
      %20 = arith.extui %19 : vector<16x128xi1> to vector<16x128xi32>
      %21 = arith.sitofp %20 : vector<16x128xi32> to vector<16x128xf32>
      %22 = arith.truncf %21 : vector<16x128xf32> to vector<16x128xbf16>
      %c0_15 = arith.constant 0 : index
      %c0_16 = arith.constant 0 : index
      %23 = vector.load %arg3[%c0_15, %c0_16] : memref<128x128xbf16, #tpu.memory_space<vmem>>, vector<128x128xbf16>
      %cst_17 = arith.constant dense<0.000000e+00> : vector<16x128xf32>
      %24 = tpu.matmul %22, %23, %cst_17 {dimension_numbers = #tpu.dot_dimension_numbers<[1], [0], [0], [1], [0, 0, 1, 1], [], []>} : vector<16x128xbf16>, vector<128x128xbf16>, vector<16x128xf32> -> vector<16x128xf32>
      %25 = arith.truncf %24 : vector<16x128xf32> to vector<16x128xbf16>
      %c0_18 = arith.constant 0 : index
      %c0_19 = arith.constant 0 : index
      %26 = vector.load %arg9[%c0_18, %c0_19] : memref<16x128xbf16, #tpu.memory_space<vmem>>, vector<16x128xbf16>
      tpu.vector_store %arg9[%c0_18, %c0_19], %25 {strides = array<i32>} : memref<16x128xbf16, #tpu.memory_space<vmem>>, vector<16x128xbf16>,
      %c0_20 = arith.constant 0 : index
      %c0_21 = arith.constant 0 : index
      %27 = vector.load %arg7[%c0_20, %c0_21] : memref<1x128xf32, #tpu.memory_space<vmem>>, vector<1x128xf32>
      %28 = vector.shape_cast %27 : vector<1x128xf32> to vector<1x128xf32>
      %29 = vector.broadcast %28 : vector<1x128xf32> to vector<16x128xf32>
      %c0_22 = arith.constant 0 : index
      %c0_23 = arith.constant 0 : index
      %30 = vector.load %arg8[%c0_22, %c0_23] : memref<16x128xf32, #tpu.memory_space<vmem>>, vector<16x128xf32>
      tpu.vector_store %arg8[%c0_22, %c0_23], %29 {strides = array<i32>} : memref<16x128xf32, #tpu.memory_space<vmem>>, vector<16x128xf32>,
    } else {
    }
    %c0 = arith.constant 0 : index
    %c0_1 = arith.constant 0 : index
    %3 = vector.load %arg9[%c0, %c0_1] : memref<16x128xbf16, #tpu.memory_space<vmem>>, vector<16x128xbf16>
    %c0_2 = arith.constant 0 : index
    %c0_3 = arith.constant 0 : index
    %4 = vector.load %arg4[%c0_2, %c0_3] : memref<128x128xbf16, #tpu.memory_space<vmem>>, vector<128x128xbf16>
    %cst = arith.constant dense<0.000000e+00> : vector<16x128xf32>
    %5 = tpu.matmul %3, %4, %cst {dimension_numbers = #tpu.dot_dimension_numbers<[1], [0], [0], [1], [0, 0, 1, 1], [], []>} : vector<16x128xbf16>, vector<128x128xbf16>, vector<16x128xf32> -> vector<16x128xf32>
    %c0_4 = arith.constant 0 : index
    %c0_5 = arith.constant 0 : index
    %6 = vector.load %arg5[%c0_4, %c0_5] : memref<1x128xf32, #tpu.memory_space<vmem>>, vector<1x128xf32>
    %7 = vector.broadcast %6 : vector<1x128xf32> to vector<16x128xf32>
    %8 = arith.addf %5, %7 : vector<16x128xf32>
    %9 = math.tanh %8 : vector<16x128xf32>
    %c0_6 = arith.constant 0 : index
    %c0_7 = arith.constant 0 : index
    %10 = vector.load %arg8[%c0_6, %c0_7] : memref<16x128xf32, #tpu.memory_space<vmem>>, vector<16x128xf32>
    %11 = arith.truncf %9 : vector<16x128xf32> to vector<16x128xbf16>
    %c0_8 = arith.constant 0 : index
    %c0_9 = arith.constant 0 : index
    %12 = vector.load %arg6[%c0_8, %c0_9] : memref<128x128xbf16, #tpu.memory_space<vmem>>, vector<128x128xbf16>
    %cst_10 = arith.constant dense<0.000000e+00> : vector<16x128xf32>
    %13 = tpu.matmul %11, %12, %cst_10 {dimension_numbers = #tpu.dot_dimension_numbers<[1], [0], [0], [1], [0, 0, 1, 1], [], []>} : vector<16x128xbf16>, vector<128x128xbf16>, vector<16x128xf32> -> vector<16x128xf32>
    %14 = arith.addf %10, %13 : vector<16x128xf32>
    %c0_11 = arith.constant 0 : index
    %c0_12 = arith.constant 0 : index
    %15 = vector.load %arg8[%c0_11, %c0_12] : memref<16x128xf32, #tpu.memory_space<vmem>>, vector<16x128xf32>
    tpu.vector_store %arg8[%c0_11, %c0_12], %14 {strides = array<i32>} : memref<16x128xf32, #tpu.memory_space<vmem>>, vector<16x128xf32>,
    return
  }
  func.func @transform_0(%arg0: i32, %arg1: i32) -> (i32, i32) {
    %c0_i32 = arith.constant 0 : i32
    %c0_i32_0 = arith.constant 0 : i32
    return %arg0, %c0_i32 : i32, i32
  }
  func.func @transform_1(%arg0: i32, %arg1: i32) -> (i32, i32) {
    %c0_i32 = arith.constant 0 : i32
    %c0_i32_0 = arith.constant 0 : i32
    %c0_i32_1 = arith.constant 0 : i32
    return %c0_i32, %c0_i32_0 : i32, i32
  }
  func.func @transform_2(%arg0: i32, %arg1: i32) -> (i32, i32) {
    %c0_i32 = arith.constant 0 : i32
    %c0_i32_0 = arith.constant 0 : i32
    return %c0_i32, %arg1 : i32, i32
  }
  func.func @transform_3(%arg0: i32, %arg1: i32) -> (i32, i32) {
    %c0_i32 = arith.constant 0 : i32
    %c0_i32_0 = arith.constant 0 : i32
    return %c0_i32, %arg1 : i32, i32
  }
  func.func @transform_4(%arg0: i32, %arg1: i32) -> (i32, i32) {
    %c0_i32 = arith.constant 0 : i32
    %c0_i32_0 = arith.constant 0 : i32
    return %arg1, %c0_i32 : i32, i32
  }
  func.func @transform_5(%arg0: i32, %arg1: i32) -> (i32, i32) {
    %c0_i32 = arith.constant 0 : i32
    %c0_i32_0 = arith.constant 0 : i32
    %c0_i32_1 = arith.constant 0 : i32
    return %c0_i32, %c0_i32_0 : i32, i32
  }
  func.func @transform_6(%arg0: i32, %arg1: i32) -> (i32, i32) {
    %c0_i32 = arith.constant 0 : i32
    %c0_i32_0 = arith.constant 0 : i32
    return %arg0, %c0_i32 : i32, i32
  }
}

</mosaic_0001>

<bundles_post_ra>
// kernel: tpu_custom_call.1
= control target key start
LH: loop header
LB: loop body
LE: loop exit
PB: predicated region body
PF: predicated region fallthrough
CT: control target
= control target key end

     0   :  { %11 = vsyncpa [#allocation4], 0  ;;  %s853_s0 = inlined_call_operand.vmem [shape: s32[16,1], index: 0, kind: input, shape index: {}]   ;;  %s854_s1 = inlined_call_operand.hbm [shape: bf16[128,128], index: 1, kind: input, shape index: {}]   ;;  %s855_s2 = inlined_call_operand.hbm [shape: bf16[128,128], index: 2, kind: input, shape index: {}]   ;;  %s856_s3 = inlined_call_operand.vmem [shape: f32[1,128], index: 3, kind: input, shape index: {}]   ;;  %s857_s4 = inlined_call_operand.hbm [shape: bf16[128,128], index: 4, kind: input, shape index: {}]   ;;  %s858_s5 = inlined_call_operand.vmem [shape: f32[1,128], index: 5, kind: input, shape index: {}]   ;;  %s859_s6 = inlined_call_operand.hbm [shape: f32[16,128], index: 6, kind: output, shape index: {}]  }
   0x1   :  { %12 = vsyncpa [#allocation7], 0 }
   0x2   :  { %13 = vsyncpa [#allocation5], 0  ;;  %s700_s21 = smov [#allocation6]   ;;  %s701_s23 = smov [#allocation3]  }
   0x3   :  { %s33_s22 = sshll.u32 %s700_s21, 4  ;;  %s21_s24 = sshll.u32 %s701_s23, 4  ;;  %s34_s22 = int_to_ptr.vmem [resolvable:$true] %s33_s22  ;;  %s747_s24 = int_to_ptr.vmem [resolvable:$true] %s21_s24 }
   0x4   :  { %s606_s27 = scalar_lea.hbm %s855_s2, 1024 }
   0x5   :  { %p607_p0 = scmp.ne.s32.totalorder %s855_s2, %s606_s27  ;;  %p610_p1 = scmp.lt.u32.totalorder %s606_s27, %s855_s2 }
   0x7   :  { %p612_p2 = pnand %p610_p1, %p607_p0 }
   0x9   :  { %615 = shalt.err (!%p612_p2)
}
   0xa   :  { %s616_s8 = scalar_lea.vmem %s34_s22, 1024  ;;  %p621_p4 = scmp.lt.s32.totalorder %s34_s22, %s34_s22 }
   0xb   :  { %p617_p3 = scmp.ne.s32.totalorder %s34_s22, %s616_s8  ;;  %p622_p5 = scmp.lt.s32.totalorder %s616_s8, %s616_s8 }
   0xd   :  { %p623_p6 = por %p622_p5, %p621_p4 }
   0xf   :  { %p624_p7 = pnand %p623_p6, %p617_p3 }
  0x11   :  { %627 = shalt.err (!%p624_p7)
}
  0x12   :  { %s702_s9 = smov 64   ;;  %s703_s10 = smov 4  }
  0x13   :  { %39 = dma.hbm_to_vmem [thread:$0]  %s855_s2, 1024, %s34_s22, [#allocation7], %s702_s9, %s702_s9, %s703_s10  }
  0x14   :  { %s628_s15 = scalar_lea.hbm %s854_s1, 1024 }
  0x15   :  { %p629_p8 = scmp.ne.s32.totalorder %s854_s1, %s628_s15  ;;  %p632_p9 = scmp.lt.u32.totalorder %s628_s15, %s854_s1 }
  0x17   :  { %p634_p10 = pnand %p632_p9, %p629_p8 }
  0x19   :  { %637 = shalt.err (!%p634_p10)
}
  0x1a   :  { %s638_s20 = scalar_lea.vmem %s747_s24, 1024  ;;  %p643_p12 = scmp.lt.s32.totalorder %s747_s24, %s747_s24 }
  0x1b   :  { %p639_p11 = scmp.ne.s32.totalorder %s747_s24, %s638_s20  ;;  %p644_p13 = scmp.lt.s32.totalorder %s638_s20, %s638_s20 }
  0x1d   :  { %p645_p0 = por %p644_p13, %p643_p12 }
  0x1f   :  { %p646_p1 = pnand %p645_p0, %p639_p11 }
  0x21   :  { %649 = shalt.err (!%p646_p1)
}
  0x22   :  { %27 = dma.hbm_to_vmem [thread:$0]  %s854_s1, 1024, %s747_s24, [#allocation4], %s702_s9, %s702_s9, %s703_s10  }
  0x23   :  { %s704_s22 = smov [#allocation8]   ;;  %s650_s27 = scalar_lea.hbm %s857_s4, 1024 }
  0x24   :  { %s47_s23 = sshll.u32 %s704_s22, 4  ;;  %p651_p2 = scmp.ne.s32.totalorder %s857_s4, %s650_s27  ;;  %s48_s23 = int_to_ptr.vmem [resolvable:$true] %s47_s23 }
  0x25   :  { %p654_p3 = scmp.lt.u32.totalorder %s650_s27, %s857_s4 }
  0x27   :  { %p656_p4 = pnand %p654_p3, %p651_p2 }
  0x29   :  { %659 = shalt.err (!%p656_p4)
}
  0x2a   :  { %s660_s8 = scalar_lea.vmem %s48_s23, 1024  ;;  %p665_p6 = scmp.lt.s32.totalorder %s48_s23, %s48_s23 }
  0x2b   :  { %p661_p5 = scmp.ne.s32.totalorder %s48_s23, %s660_s8  ;;  %p666_p7 = scmp.lt.s32.totalorder %s660_s8, %s660_s8 }
  0x2d   :  { %p667_p8 = por %p666_p7, %p665_p6 }
  0x2f   :  { %p668_p9 = pnand %p667_p8, %p661_p5 }
  0x31   :  { %671 = shalt.err (!%p668_p9)
}
  0x32   :  { %53 = dma.hbm_to_vmem [thread:$0]  %s857_s4, 1024, %s48_s23, [#allocation7], %s702_s9, %s702_s9, %s703_s10  }
  0x33   :  { %694 = dma.done.wait [#allocation4], 1024  }
  0x34   :  { %695 = vsyncadd [#allocation4], 4294966272 }
  0x35   :  { %696 = dma.done.wait [#allocation7], 2048  }
  0x36   :  { %697 = vsyncadd [#allocation7], 4294965248  ;;  %v705_v0 = vmov 0   ;;  %v706_v1 = vmov 0.0   ;;  %v70_v2 = vld [vmem:[%s853_s0] sm:$0xff]  ;;  %v71_v4 = vld [vmem:[%s853_s0 + $0x8] sm:$0xff]  ;;  %v72_v19 = vlaneseq }
  0x37   :  { %577 = vset.pattern.permute.xlu0 %v705_v0  ;;  %505 = vmatprep.subr.bf16.mxu0 %v706_v1  ;;  %v578_v3 = vld [vmem:[#allocation3] sm:$0xff]   ;;  %v579_v5 = vld [vmem:[#allocation3 + $0x8] sm:$0xff]   ;;  %vm707_vm0 = vmmov 0   ;;  %v580_v6 = vld [vmem:[#allocation3 + $0x10] sm:$0xff]   ;;  %v708_v23 = vmov 1.0|1.0  }
  0x38   :  { %525 = vmatprep.subr.bf16.mxu1 %v706_v1  ;;  %75 = vperm.xlu0 %577, %v70_v2   ;;  %v586_v7 = vld [vmem:[#allocation6] sm:$0xff]   ;;  %v587_v8 = vld [vmem:[#allocation6 + $0x8] sm:$0xff]   ;;  %v581_v9 = vld [vmem:[#allocation3 + $0x18] sm:$0xff]   ;;  %v73_v21 = vand.u32 127, %v72_v19  ;;  %s709_s15 = smov [#allocation9]  }
  0x39   :  { %506 = vmatpush3.bf16.msra.mxu0 %v578_v3  ;;  %521 = vmatprep.mubr.msk.bf16.mxu0 %vm707_vm0, %v706_v1  ;;  %v588_v10 = vld [vmem:[#allocation6 + $0x10] sm:$0xff]   ;;  %v582_v11 = vld [vmem:[#allocation3 + $0x20] sm:$0xff]   ;;  %v589_v12 = vld [vmem:[#allocation6 + $0x18] sm:$0xff]   ;;  %s435_s16 = sshll.u32 %s709_s15, 4  ;;  %s436_s16 = int_to_ptr.vmem [resolvable:$true] %s435_s16 }
  0x3a   :  { %507 = vmatprep.subr.bf16.mxu0 %v706_v1  ;;  %541 = vmatprep.mubr.msk.bf16.mxu1 %vm707_vm0, %v706_v1  ;;  %v583_v13 = vld [vmem:[#allocation3 + $0x28] sm:$0xff]   ;;  %v590_v14 = vld [vmem:[#allocation6 + $0x20] sm:$0xff]   ;;  %v584_v15 = vld [vmem:[#allocation3 + $0x30] sm:$0xff]   ;;  %p677_p11 = scmp.lt.s32.totalorder %s436_s16, %s436_s16 }
  0x3b   :  { %526 = vmatpush3.bf16.msra.mxu1 %v586_v7  ;;  %v591_v16 = vld [vmem:[#allocation6 + $0x28] sm:$0xff]   ;;  %v585_v17 = vld [vmem:[#allocation3 + $0x38] sm:$0xff]   ;;  %v592_v18 = vld [vmem:[#allocation6 + $0x30] sm:$0xff]  }
  0x3c   :  { %78 = vperm.xlu0 %577, %v71_v4   ;;  %527 = vmatprep.subr.bf16.mxu1 %v706_v1  ;;  %v593_v24 = vld [vmem:[#allocation6 + $0x38] sm:$0xff]   ;;  %v594_v25 = vld [vmem:[#allocation8] sm:$0xff]   ;;  %v595_v26 = vld [vmem:[#allocation8 + $0x8] sm:$0xff]  }
  0x3d   :  { %508 = vmatpush3.bf16.msra.mxu0 %v579_v5  ;;  %v596_v27 = vld [vmem:[#allocation8 + $0x10] sm:$0xff]   ;;  %v597_v28 = vld [vmem:[#allocation8 + $0x18] sm:$0xff]   ;;  %v598_v34 = vld [vmem:[#allocation8 + $0x20] sm:$0xff]  }
  0x3e   :  { %509 = vmatprep.subr.bf16.mxu0 %v706_v1  ;;  %v599_v35 = vld [vmem:[#allocation8 + $0x28] sm:$0xff]   ;;  %v600_v36 = vld [vmem:[#allocation8 + $0x30] sm:$0xff]   ;;  %v601_v37 = vld [vmem:[#allocation8 + $0x38] sm:$0xff]  }
  0x3f   :  { %528 = vmatpush3.bf16.msra.mxu1 %v587_v8  ;;  %v461_v38 = vld [vmem:[%s856_s3] ss:$0 sm:$0xff]  ;;  %s672_s3 = scalar_lea.vmem %s436_s16, 256 }
  0x40   :  { %529 = vmatprep.subr.bf16.mxu1 %v706_v1  ;;  %v460_v48 = vld [vmem:[%s858_s5] ss:$0 sm:$0xff]  ;;  %p673_p10 = scmp.ne.s32.totalorder %s436_s16, %s672_s3  ;;  %p678_p12 = scmp.lt.s32.totalorder %s672_s3, %s672_s3 }
  0x41   :  { %510 = vmatpush3.bf16.msra.mxu0 %v580_v6 }
  0x42   :  { %511 = vmatprep.subr.bf16.mxu0 %v706_v1  ;;  %p679_p13 = por %p678_p12, %p677_p11 }
  0x43   :  { %530 = vmatpush3.bf16.msra.mxu1 %v588_v10 }
  0x44   :  { %531 = vmatprep.subr.bf16.mxu1 %v706_v1  ;;  %p680_p0 = pnand %p679_p13, %p673_p10 }
  0x45   :  { %512 = vmatpush3.bf16.msra.mxu0 %v581_v9 }
  0x46   :  { %513 = vmatprep.subr.bf16.mxu0 %v706_v1 }
  0x47   :  { %532 = vmatpush3.bf16.msra.mxu1 %v589_v12 }
  0x48   :  { %533 = vmatprep.subr.bf16.mxu1 %v706_v1 }
  0x49   :  { %514 = vmatpush3.bf16.msra.mxu0 %v582_v11 }
  0x4a   :  { %515 = vmatprep.subr.bf16.mxu0 %v706_v1 }
  0x4b   :  { %534 = vmatpush3.bf16.msra.mxu1 %v590_v14 }
  0x4c   :  { %535 = vmatprep.subr.bf16.mxu1 %v706_v1 }
  0x4d   :  { %516 = vmatpush3.bf16.msra.mxu0 %v583_v13 }
  0x4e   :  { %517 = vmatprep.subr.bf16.mxu0 %v706_v1 }
  0x4f   :  { %536 = vmatpush3.bf16.msra.mxu1 %v591_v16 }
  0x50   :  { %537 = vmatprep.subr.bf16.mxu1 %v706_v1 }
  0x51   :  { %518 = vmatpush3.bf16.msra.mxu0 %v584_v15 }
  0x52   :  { %519 = vmatprep.subr.bf16.mxu0 %v706_v1 }
  0x53   :  { %538 = vmatpush3.bf16.msra.mxu1 %v592_v18 }
  0x54   :  { %539 = vmatprep.subr.bf16.mxu1 %v706_v1 }
  0x55   :  { %520 = vmatpush3.bf16.msra.mxu0 %v585_v17 }
  0x56   :  { %545 = vmatprep.subr.bf16.mxu0 %v706_v1 }
  0x57   :  { %540 = vmatpush3.bf16.msra.mxu1 %v593_v24 }
  0xb7   :  { %v76_v20 = vpop.permute.xlu0 %75 }
  0xb8   :  { %vm80_vm1 = vcmp.eq.s32.totalorder %v76_v20, %v73_v21 }
  0xbb   :  { %v79_v22 = vpop.permute.xlu0 %78 }
  0xbc   :  { %vm81_vm2 = vcmp.eq.s32.totalorder %v79_v22, %v73_v21 }
  0xbd   :  { %vm458_vm3 = vmpackc.low %vm81_vm2, %vm80_vm1 }
  0xbe   :  { %522 = vmatmul.mubr.msk.bf16.vlgmr.msra.gmra.mrb[0].mxu0 %vm458_vm3, %v708_v23 }
  0xbf   :  { %561 = vmatprep.mubr.msk.bf16.mxu0 %vm707_vm0, %v706_v1  ;;  %546 = vmatpush3.bf16.msra.mxu0 %v594_v25 }
  0xc0   :  { %547 = vmatprep.subr.bf16.mxu0 %v706_v1 }
  0xc3   :  { %548 = vmatpush3.bf16.msra.mxu0 %v595_v26 }
  0xc4   :  { %549 = vmatprep.subr.bf16.mxu0 %v706_v1 }
  0xc7   :  { %550 = vmatpush3.bf16.msra.mxu0 %v596_v27 }
  0xc8   :  { %551 = vmatprep.subr.bf16.mxu0 %v706_v1 }
  0xcb   :  { %552 = vmatpush3.bf16.msra.mxu0 %v597_v28 }
  0xcc   :  { %553 = vmatprep.subr.bf16.mxu0 %v706_v1 }
  0xcf   :  { %554 = vmatpush3.bf16.msra.mxu0 %v598_v34 }
  0xd0   :  { %555 = vmatprep.subr.bf16.mxu0 %v706_v1 }
  0xd3   :  { %556 = vmatpush3.bf16.msra.mxu0 %v599_v35 }
  0xd4   :  { %557 = vmatprep.subr.bf16.mxu0 %v706_v1 }
  0xd7   :  { %558 = vmatpush3.bf16.msra.mxu0 %v600_v36 }
  0xd8   :  { %559 = vmatprep.subr.bf16.mxu0 %v706_v1 }
  0xdb   :  { %560 = vmatpush3.bf16.msra.mxu0 %v601_v37 }
 0x191   :  { %v185_v29 = vpop.f32.mrb[0].mxu0 }
 0x192   :  { %v523_v30 = vpop.f32.mrb[1].mxu0 }
 0x193   :  { %v188_v31 = vpop.f32.mrb[2].mxu0 }
 0x194   :  { %v192_v32 = vpack.c.bf16 %v188_v31, %v185_v29  ;;  %v524_v33 = vpop.f32.mrb[3].mxu0 }
 0x196   :  { %542 = vmatmul.mubr.bf16.vlgmr.msra.gmra.mrb[0].mxu1 %v192_v32 }
 0x269   :  { %v309_v39 = vpop.f32.mrb[0].mxu1 }
 0x26a   :  { %v310_v40 = vadd.f32 %v461_v38, %v309_v39  ;;  %v543_v41 = vpop.f32.mrb[1].mxu1 }
 0x26b   :  { %v312_v42 = vpop.f32.mrb[2].mxu1 }
 0x26c   :  { %v313_v43 = vadd.f32 %v461_v38, %v312_v42  ;;  %v544_v44 = vpop.f32.mrb[3].mxu1  ;;  %602 = vtanh.f32 %v310_v40 }
 0x26e   :  { %604 = vtanh.f32 %v313_v43 }
 0x276   :  { %v603_v45 = vpop.eup %602 }
 0x278   :  { %v605_v46 = vpop.eup %604 }
 0x279   :  { %v320_v47 = vpack.c.bf16 %v605_v46, %v603_v45 }
 0x27b   :  { %562 = vmatmul.mubr.bf16.vlgmr.msra.gmra.mrb[4].mxu0 %v320_v47 }
 0x34e   :  { %v419_v49 = vpop.f32.mrb[4].mxu0 }
 0x34f   :  { %v426_v50 = vadd.f32 %v460_v48, %v419_v49  ;;  %v563_v51 = vpop.f32.mrb[5].mxu0 }
 0x350   :  { %v422_v52 = vpop.f32.mrb[6].mxu0 }
 0x351   :  { %428 = vst [vmem:[#allocation9] sm:$0xff] %v426_v50  ;;  %v427_v53 = vadd.f32 %v460_v48, %v422_v52  ;;  %v564_v54 = vpop.f32.mrb[7].mxu0 }
 0x353   :  { %429 = vst [vmem:[#allocation9 + $0x8] sm:$0xff] %v427_v53 }
 0x354   :  { %683 = shalt.err (!%p680_p0)
}
 0x355   :  { %s684_s18 = scalar_lea.hbm %s859_s6, 256 }
 0x356   :  { %p685_p1 = scmp.ne.s32.totalorder %s859_s6, %s684_s18  ;;  %p688_p2 = scmp.lt.u32.totalorder %s684_s18, %s859_s6 }
 0x358   :  { %p690_p3 = pnand %p688_p2, %p685_p1 }
 0x35a   :  { %693 = shalt.err (!%p690_p3)
}
 0x35b   :  { %s710_s22 = smov 128   ;;  %s711_s23 = smov 8  }
 0x35c   :  { %441 = dma.vmem_to_hbm [thread:$0]  %s436_s16, 256, %s859_s6, [#allocation5], %s710_s22, %s710_s22, %s711_s23  }
 0x35d   :  { %698 = dma.done.wait [#allocation5], 256  }
 0x35e   :  { %699 = vsyncadd [#allocation5], 4294967040 }
 0x35f   :  { %445 = vsyncpa [#allocation4], 1 }
 0x360   :  { %446 = vsyncpa [#allocation7], 1 }
 0x361   :  { %447 = vsyncpa [#allocation5], 1 }

</bundles_post_ra>
